<compile_context>
chip_gen: v7x
topology: tpu7x:2x2x1
jax: 0.10.0
libtpu: 0.0.40
codegen_flags: <defaults>
</compile_context>

<pallas_src>
import math

import jax
import jax.numpy as jnp
from jax.experimental import pallas as pl
from jax.experimental.pallas import tpu as pltpu


def _sigmoid_loss_kernel(logits_ref, weights_ref, out_ref):
    x = logits_ref[...].astype(jnp.float32)            # [TB, C]
    w = weights_ref[...].astype(jnp.float32)            # [1, C] (resident)
    TB, C = x.shape

    # Label-independent part of BCE-with-logits (the -x*z term is handled in
    # the XLA epilogue as a gather):  max(x, 0) + log1p(exp(-|x|))
    sp = jnp.maximum(x, 0.0) + jnp.log1p(jnp.exp(-jnp.abs(x)))
    weighted = sp * w                                    # [TB, C]

    # Fold the batch-tile rows onto the 8 sublanes (layout-free reshape + VPU
    # adds); defer the cross-lane collapse + /B to a tiny XLA epilogue.
    out_ref[...] = weighted.reshape(TB // 8, 8, C).sum(axis=0)


def _round_up(x: int, m: int) -> int:
    return ((x + m - 1) // m) * m


def _cdiv(a: int, b: int) -> int:
    return -(-a // b)


def _vmem_capacity_bytes() -> int:
    # Generation-aware VMEM budget; conservative 64 MiB fallback (v7x-sized).
    try:
        return int(pltpu.get_tpu_info().vmem_capacity_bytes)
    except Exception:
        return 64 * 1024 * 1024


def _choose_block_rows(B: int, C_pad: int, itemsize: int, tile_cap_bytes: int) -> int:
    # Largest tile that fits the per-generation cap, but enough tiles that the
    # "parallel" batch axis actually shards across both v7x TensorCores.
    max_rows_by_vmem = max(16, tile_cap_bytes // max(1, C_pad * itemsize))
    tb = min(2048, max_rows_by_vmem)
    if B > 16:
        target_tiles = 4 if B >= 64 else 2
        tb = min(tb, _round_up(_cdiv(B, target_tiles), 16))
    else:
        tb = 16
    tb = max(16, (tb // 16) * 16)   # multiple of 16: covers f32 (8) and bf16 (16) packing
    return tb


def sigmoid_loss(pred_logits: jax.Array, targets: jax.Array, per_cls_weights,
                 block_rows: int | None = None) -> jax.Array:
    """pred_logits: [B, C] float; targets: [B] int class labels; per_cls_weights: [C] float."""
    B, C = pred_logits.shape
    itemsize = jnp.dtype(pred_logits.dtype).itemsize

    vmem_cap = _vmem_capacity_bytes()
    if vmem_cap <= 64 * 1024 * 1024:            # v7x-class: 64 MiB VMEM per TC
        tile_cap_bytes = 8 * 1024 * 1024
        limit_cap = 40 * 1024 * 1024
    else:                                        # v5e / v6e: 128 MiB VMEM
        tile_cap_bytes = 16 * 1024 * 1024
        limit_cap = 96 * 1024 * 1024

    # Pad the class axis to a multiple of 128 (lane-dense vregs, unmasked stores).
    C_pad = _round_up(C, 128)

    TB = block_rows if block_rows is not None else _choose_block_rows(B, C_pad, itemsize, tile_cap_bytes)
    assert TB % 16 == 0, "block_rows must be a multiple of 16"

    num_tiles = _cdiv(B, TB)
    B_pad = num_tiles * TB
    pad_rows = B_pad - B
    pad_cols = C_pad - C

    # Zero-pad logits (padded rows/cols are corrected for exactly in the epilogue).
    if pad_rows or pad_cols:
        logits_p = jnp.pad(pred_logits, ((0, pad_rows), (0, pad_cols)))
    else:
        logits_p = pred_logits

    weights_f32 = jnp.asarray(per_cls_weights, dtype=jnp.float32).reshape(C)
    weights_2d = (jnp.pad(weights_f32, ((0, pad_cols),)) if pad_cols else weights_f32).reshape(1, C_pad)

    # Explicit VMEM budget: double-buffered logits tile + weights + (8, C) partial.
    bytes_needed = 2 * (TB * C_pad * itemsize) + 2 * (C_pad * 4) + 2 * (8 * C_pad * 4)
    vmem_limit = int(min(limit_cap, max(16 * 1024 * 1024, bytes_needed + (4 << 20))))

    # NOTE: on v5e (HBM-bound) a deeper pipeline (pipeline_mode=pl.Buffered(3) on
    # the logits spec) is worth a sweep; left at the default depth here.
    partials = pl.pallas_call(
        _sigmoid_loss_kernel,
        out_shape=jax.ShapeDtypeStruct((num_tiles * 8, C_pad), jnp.float32),
        grid_spec=pltpu.PrefetchScalarGridSpec(
            num_scalar_prefetch=0,
            grid=(num_tiles,),
            in_specs=[
                pl.BlockSpec((TB, C_pad), lambda i: (i, 0)),   # logits tile
                pl.BlockSpec((1, C_pad), lambda i: (0, 0)),    # resident class weights
            ],
            out_specs=pl.BlockSpec((8, C_pad), lambda i: (i, 0)),
        ),
        compiler_params=pltpu.CompilerParams(
            dimension_semantics=("parallel",),   # independent per-tile partials -> both TCs on v7x
            vmem_limit_bytes=vmem_limit,
        ),
    )(logits_p, weights_2d)

    # --- tiny XLA epilogue ---
    # 1) cross-lane collapse of the small (num_tiles*8, C_pad) partials,
    sp_sum = jnp.sum(partials)
    # 2) subtract the exact contribution of the zero-logit padded rows: pad * ln(2) * sum(w),
    pad_corr = jnp.float32(pad_rows) * jnp.float32(math.log(2.0)) * jnp.sum(weights_f32)
    # 3) subtract the label term sum_b x[b, t_b] * w[t_b] (the -x*z part of BCE).
    #    TODO(synk): targets >= C are clamped by take_along_axis instead of erroring like torch scatter_.
    t = targets.astype(jnp.int32)
    x_t = jnp.take_along_axis(pred_logits.astype(jnp.float32), t[:, None], axis=1)[:, 0]
    w_t = jnp.take(weights_f32, t)
    gather_term = jnp.sum(x_t * w_t)

    return (sp_sum - pad_corr - gather_term) / jnp.float32(B)


def _reference(pred_logits, targets, per_cls_weights):
    # Pure-JAX reference mirroring the PyTorch math.
    B, C = pred_logits.shape
    x = pred_logits.astype(jnp.float32)
    z = jax.nn.one_hot(targets, C, dtype=jnp.float32)
    bce = jnp.maximum(x, 0.0) - x * z + jnp.log1p(jnp.exp(-jnp.abs(x)))
    weighted = bce * jnp.asarray(per_cls_weights, jnp.float32)[None, :]
    return jnp.sum(weighted) / B


if __name__ == "__main__":
    key = jax.random.PRNGKey(0)
    ks = jax.random.split(key, 9)

    # Test 1: tiny shape (C padded 8 -> 128, single tile, padded batch rows).
    B, C = 4, 8
    pred_logits = jax.random.normal(ks[0], (B, C), dtype=jnp.float32)
    targets = jax.random.randint(ks[1], (B,), 0, C, dtype=jnp.int32)
    per_cls_weights = jax.random.uniform(ks[2], (C,), dtype=jnp.float32, minval=0.5, maxval=1.5)

    loss = sigmoid_loss(pred_logits, targets, per_cls_weights)
    jax.block_until_ready(loss)
    ref = _reference(pred_logits, targets, per_cls_weights)
    assert jnp.allclose(loss, ref, rtol=2e-5, atol=1e-4), (loss, ref)

    # Test 2: multi-tile grid with ragged batch (block_rows=16 -> 3 tiles + padded rows).
    B2, C2 = 40, 128
    pred_logits2 = jax.random.normal(ks[3], (B2, C2), dtype=jnp.float32)
    targets2 = jax.random.randint(ks[4], (B2,), 0, C2, dtype=jnp.int32)
    per_cls_weights2 = jax.random.uniform(ks[5], (C2,), dtype=jnp.float32, minval=0.5, maxval=1.5)

    loss2 = sigmoid_loss(pred_logits2, targets2, per_cls_weights2, block_rows=16)
    jax.block_until_ready(loss2)
    ref2 = _reference(pred_logits2, targets2, per_cls_weights2)
    assert jnp.allclose(loss2, ref2, rtol=2e-5, atol=1e-4), (loss2, ref2)

    # Test 3: bf16 logits, C not a multiple of 128, default (auto) tiling.
    B3, C3 = 48, 200
    pred_logits3 = jax.random.normal(ks[6], (B3, C3), dtype=jnp.float32).astype(jnp.bfloat16)
    targets3 = jax.random.randint(ks[7], (B3,), 0, C3, dtype=jnp.int32)
    per_cls_weights3 = jax.random.uniform(ks[8], (C3,), dtype=jnp.float32, minval=0.5, maxval=1.5)

    loss3 = sigmoid_loss(pred_logits3, targets3, per_cls_weights3)
    jax.block_until_ready(loss3)
    ref3 = _reference(pred_logits3, targets3, per_cls_weights3)
    assert jnp.allclose(loss3, ref3, rtol=2e-5, atol=2e-3), (loss3, ref3)

    print("KERNEL_OK")
</pallas_src>

<mosaic_0001>
module attributes {stable_mosaic.version = 11 : i64} {
  func.func @_sigmoid_loss_kernel(%arg0: i32, %arg1: memref<16x128xf32, #tpu.memory_space<vmem>>, %arg2: memref<1x128xf32, #tpu.memory_space<vmem>>, %arg3: memref<8x128xf32, #tpu.memory_space<vmem>>) attributes {dimension_semantics = [#tpu.dimension_semantics<parallel>], iteration_bounds = array<i64: 1>, scalar_prefetch = 0 : i64, scratch_operands = 0 : i64, tpu.core_type = #tpu.core_type<tc>, window_params = [{transform_indices = @transform_0, window_bounds = array<i64: 16, 128>}, {pipeline_mode = #tpu.pipeline_mode<synchronous>, transform_indices = @transform_1, window_bounds = array<i64: 1, 128>}, {transform_indices = @transform_2, window_bounds = array<i64: 8, 128>}]} {
    %c0 = arith.constant 0 : index
    %c0_0 = arith.constant 0 : index
    %0 = vector.load %arg1[%c0, %c0_0] : memref<16x128xf32, #tpu.memory_space<vmem>>, vector<16x128xf32>
    %c0_1 = arith.constant 0 : index
    %c0_2 = arith.constant 0 : index
    %1 = vector.load %arg2[%c0_1, %c0_2] : memref<1x128xf32, #tpu.memory_space<vmem>>, vector<1x128xf32>
    %cst = arith.constant 0.000000e+00 : f32
    %2 = vector.broadcast %cst : f32 to vector<16x128xf32>
    %3 = arith.maximumf %0, %2 : vector<16x128xf32>
    %4 = math.absf %0 : vector<16x128xf32>
    %cst_3 = arith.constant 0.000000e+00 : f32
    %5 = vector.broadcast %cst_3 : f32 to vector<16x128xf32>
    %6 = arith.subf %5, %4 : vector<16x128xf32>
    %7 = math.exp %6 : vector<16x128xf32>
    %8 = math.log1p %7 : vector<16x128xf32>
    %9 = arith.addf %3, %8 : vector<16x128xf32>
    %10 = vector.broadcast %1 : vector<1x128xf32> to vector<16x128xf32>
    %11 = arith.mulf %9, %10 : vector<16x128xf32>
    %12 = vector.shape_cast %11 : vector<16x128xf32> to vector<2x8x128xf32>
    %cst_4 = arith.constant dense<0.000000e+00> : vector<8x128xf32>
    %13 = vector.multi_reduction <add>, %12, %cst_4 [0] : vector<2x8x128xf32> to vector<8x128xf32>
    %c0_5 = arith.constant 0 : index
    %c0_6 = arith.constant 0 : index
    %14 = vector.load %arg3[%c0_5, %c0_6] : memref<8x128xf32, #tpu.memory_space<vmem>>, vector<8x128xf32>
    tpu.vector_store %arg3[%c0_5, %c0_6], %13 {strides = array<i32>} : memref<8x128xf32, #tpu.memory_space<vmem>>, vector<8x128xf32>,
    return
  }
  func.func @transform_0(%arg0: i32) -> (i32, i32) {
    %c0_i32 = arith.constant 0 : i32
    %c0_i32_0 = arith.constant 0 : i32
    return %arg0, %c0_i32 : i32, i32
  }
  func.func @transform_1(%arg0: i32) -> (i32, i32) {
    %c0_i32 = arith.constant 0 : i32
    %c0_i32_0 = arith.constant 0 : i32
    %c0_i32_1 = arith.constant 0 : i32
    return %c0_i32, %c0_i32_0 : i32, i32
  }
  func.func @transform_2(%arg0: i32) -> (i32, i32) {
    %c0_i32 = arith.constant 0 : i32
    %c0_i32_0 = arith.constant 0 : i32
    return %arg0, %c0_i32 : i32, i32
  }
}

</mosaic_0001>

<bundles_post_ra>
// kernel: tpu_custom_call.1
= control target key start
LH: loop header
LB: loop body
LE: loop exit
PB: predicated region body
PF: predicated region fallthrough
CT: control target
= control target key end

     0   :  { %7 = vsyncpa [#allocation3], 0  ;;  %s191_s0 = inlined_call_operand.hbm [shape: f32[16,128], index: 0, kind: input, shape index: {}]   ;;  %s192_s1 = inlined_call_operand.vmem [shape: f32[1,128], index: 1, kind: input, shape index: {}]   ;;  %s193_s2 = inlined_call_operand.hbm [shape: f32[8,128], index: 2, kind: output, shape index: {}]  }
   0x1   :  { %8 = vsyncpa [#allocation4], 0  ;;  %s145_s9 = smov [#allocation2]   ;;  %s97_s13 = scalar_lea.hbm %s191_s0, 256 }
   0x2   :  { %s14_s10 = sshll.u32 %s145_s9, 4  ;;  %p98_p0 = scmp.ne.s32.totalorder %s191_s0, %s97_s13  ;;  %s15_s10 = int_to_ptr.vmem [resolvable:$true] %s14_s10 }
   0x3   :  { %p101_p1 = scmp.lt.u32.totalorder %s97_s13, %s191_s0 }
   0x5   :  { %p103_p2 = pnand %p101_p1, %p98_p0 }
   0x7   :  { %106 = shalt.err (!%p103_p2)
}
   0x8   :  { %s107_s18 = scalar_lea.vmem %s15_s10, 256  ;;  %p112_p4 = scmp.lt.s32.totalorder %s15_s10, %s15_s10 }
   0x9   :  { %p108_p3 = scmp.ne.s32.totalorder %s15_s10, %s107_s18  ;;  %p113_p5 = scmp.lt.s32.totalorder %s107_s18, %s107_s18 }
   0xb   :  { %p114_p6 = por %p113_p5, %p112_p4 }
   0xd   :  { %p115_p7 = pnand %p114_p6, %p108_p3 }
   0xf   :  { %118 = shalt.err (!%p115_p7)
}
  0x10   :  { %s146_s19 = smov 128   ;;  %s147_s20 = smov 8  }
  0x11   :  { %20 = dma.hbm_to_vmem [thread:$0]  %s191_s0, 256, %s15_s10, [#allocation3], %s146_s19, %s146_s19, %s147_s20  }
  0x12   :  { %141 = dma.done.wait [#allocation3], 256  }
  0x13   :  { %142 = vsyncadd [#allocation3], 4294967040  ;;  %v26_v0 = vld [vmem:[#allocation2] sm:$0xff]  ;;  %v27_v1 = vld [vmem:[#allocation2 + $0x8] sm:$0xff]  ;;  %s148_s24 = smov [#allocation5]  }
  0x14   :  { %v31_v2 = vand.u32 2147483647, %v26_v0  ;;  %v32_v3 = vand.u32 2147483647, %v27_v1  ;;  %v29_v20 = vmax.f32 %v26_v0, 0.0  ;;  %v30_v23 = vmax.f32 %v27_v1, 0.0 }
  0x15   :  { %v84_v26 = vld [vmem:[%s192_s1] ss:$0 sm:$0xff]  ;;  %s75_s25 = sshll.u32 %s148_s24, 4  ;;  %s76_s25 = int_to_ptr.vmem [resolvable:$true] %s75_s25 }
  0x16   :  { %v33_v4 = vsub.f32 0.0, %v31_v2  ;;  %v34_v5 = vsub.f32 0.0, %v32_v3  ;;  %s119_s26 = scalar_lea.vmem %s76_s25, 128  ;;  %p124_p9 = scmp.lt.s32.totalorder %s76_s25, %s76_s25 }
  0x17   :  { %p120_p8 = scmp.ne.s32.totalorder %s76_s25, %s119_s26  ;;  %p125_p10 = scmp.lt.s32.totalorder %s119_s26, %s119_s26 }
  0x18   :  { %v35_v6 = vmul.f32 1.442695, %v33_v4  ;;  %v37_v7 = vmul.f32 1.442695, %v34_v5 }
  0x19   :  { %p126_p11 = por %p125_p10, %p124_p9 }
  0x1a   :  { %89 = vpow2.f32 %v35_v6 }
  0x1b   :  { %91 = vpow2.f32 %v37_v7  ;;  %p127_p12 = pnand %p126_p11, %p120_p8 }
  0x24   :  { %v90_v8 = vpop.eup %89 }
  0x25   :  { %v92_v9 = vpop.eup %91  ;;  %v39_v10 = vadd.f32 1.0, %v90_v8  ;;  %v42_v12 = vmul.f32 -0.5, %v90_v8  ;;  %v45_v15 = vand.u32 2147483647, %v90_v8 }
  0x26   :  { %v48_v11 = vadd.f32 1.0, %v92_v9  ;;  %v51_v13 = vmul.f32 -0.5, %v92_v9  ;;  %v54_v17 = vand.u32 2147483647, %v92_v9 }
  0x27   :  { %93 = vlog2.f32 %v39_v10  ;;  %v43_v14 = vadd.f32 1.0, %v42_v12  ;;  %vm46_vm0 = vcmp.lt.f32.partialorder %v45_v15, 0.0004427343 }
  0x28   :  { %95 = vlog2.f32 %v48_v11  ;;  %v52_v16 = vadd.f32 1.0, %v51_v13  ;;  %vm55_vm1 = vcmp.lt.f32.partialorder %v54_v17, 0.0004427343 }
  0x29   :  { %v44_v18 = vmul.f32 %v90_v8, %v43_v14 }
  0x2a   :  { %v53_v21 = vmul.f32 %v92_v9, %v52_v16 }
  0x31   :  { %v94_v19 = vpop.eup %93 }
  0x32   :  { %v96_v22 = vpop.eup %95  ;;  %v41_v24 = vmul.f32 0.6931472, %v94_v19 }
  0x33   :  { %v50_v25 = vmul.f32 0.6931472, %v96_v22 }
  0x34   :  { %v47_v27 = vsel %vm46_vm0, %v44_v18, %v41_v24 }
  0x35   :  { %v56_v28 = vsel %vm55_vm1, %v53_v21, %v50_v25  ;;  %v57_v29 = vadd.f32 %v47_v27, %v29_v20 }
  0x36   :  { %v58_v30 = vadd.f32 %v56_v28, %v30_v23 }
  0x37   :  { %v65_v31 = vmul.f32 %v84_v26, %v57_v29 }
  0x38   :  { %v66_v32 = vmul.f32 %v84_v26, %v58_v30 }
  0x3a   :  { %v67_v33 = vadd.f32 %v66_v32, %v65_v31 }
  0x3c   :  { %68 = vst [vmem:[#allocation5] sm:$0xff] %v67_v33 }
  0x3d   :  { %130 = shalt.err (!%p127_p12)
}
  0x3e   :  { %s131_s28 = scalar_lea.hbm %s193_s2, 128 }
  0x3f   :  { %p132_p13 = scmp.ne.s32.totalorder %s193_s2, %s131_s28  ;;  %p135_p0 = scmp.lt.u32.totalorder %s131_s28, %s193_s2 }
  0x41   :  { %p137_p1 = pnand %p135_p0, %p132_p13 }
  0x43   :  { %140 = shalt.err (!%p137_p1)
}
  0x44   :  { %78 = dma.vmem_to_hbm [thread:$0]  %s76_s25, 128, %s193_s2, [#allocation4]  }
  0x45   :  { %143 = dma.done.wait [#allocation4], 128  }
  0x46   :  { %144 = vsyncadd [#allocation4], 4294967168 }
  0x47   :  { %82 = vsyncpa [#allocation3], 1 }
  0x48   :  { %83 = vsyncpa [#allocation4], 1 }

</bundles_post_ra>
